<compile_context>
chip_gen: v7x
topology: tpu7x:2x2x1
jax: 0.10.0
libtpu: 0.0.40
codegen_flags: <defaults>
</compile_context>

<pallas_src>
import math
from functools import partial

import jax
import jax.numpy as jnp
from jax.experimental import pallas as pl
from jax.experimental.pallas import tpu as pltpu

EPS = 1e-5  # nn.BatchNorm2d default eps


# ------------------------------ Pallas kernel -------------------------------

def make_fused_block_kernel(N, C, width, Ho, Wo, L, mxu_dtype, precision):
    """conv0(stride2) -> BN1 -> ReLU -> conv1 -> (+residual), one invocation.

    Lane layout: pixel (n, y, x) -> lane n*(Ho+1)*(Wo+1) + y*(Wo+1) + x,
    padded to L lanes.  Row Ho / col Wo are guard positions (zeroed), so a
    3x3 stride-1 tap is a pure lane roll with no extra masking.
      planes_ref : (4, C, L)       BN0+ReLU'd stride-2 parity planes
      w0_ref     : (9, width, C)   conv0 weight per tap
      w1_ref     : (9, width, width) conv1 weight per tap
      mask_ref   : (1, L)          1.0 on real output pixels, else 0.0
      skip_ref   : (width, L)      avg_pool(x) ++ zeros   (aliased to output)
      out_ref    : (width, L)
    """
    Wo1 = Wo + 1
    P = N * Ho * Wo                    # BN1 population (real output pixels)
    inv_p = 1.0 / P
    taps = [(dy, dx) for dy in range(3) for dx in range(3)]

    def kernel(planes_ref, w0_ref, w1_ref, mask_ref, skip_ref, out_ref):
        # ---- conv0 (3x3, stride 2): tap-accumulated matmuls on parity planes.
        # Tap (dy,dx) lives in parity plane (dy%2, dx%2) shifted by
        # (dy//2)*(Wo+1) + dx//2 lanes (guard row/col keeps images apart).
        planes = [planes_ref[i] for i in range(4)]       # 4 x (C, L)
        h = jnp.zeros((width, L), jnp.float32)
        for t, (dy, dx) in enumerate(taps):
            par = (dy % 2) * 2 + (dx % 2)
            s = (dy // 2) * Wo1 + (dx // 2)
            tap = planes[par]
            if s:
                tap = pltpu.roll(tap, shift=(-s) % L, axis=1)  # y[:,p]=x[:,p+s]
            h = h + jnp.dot(w0_ref[t], tap,
                            preferred_element_type=jnp.float32,
                            precision=precision)

        # ---- BatchNorm1 (batch stats, biased var, one-pass moments) + ReLU.
        mask = mask_ref[...]                              # (1, L)
        hm = h * mask
        s1 = jnp.sum(hm, axis=1, keepdims=True)
        s2 = jnp.sum(hm * hm, axis=1, keepdims=True)
        mu = s1 * inv_p
        var = s2 * inv_p - mu * mu
        hn = jnp.maximum((h - mu) * jax.lax.rsqrt(var + EPS), 0.0) * mask
        # hn is exactly 0 on guard rows/cols and lane padding, so conv1's
        # zero padding is already encoded in the layout.
        hn = hn.astype(mxu_dtype)

        # ---- conv1 (3x3, stride 1), tap-accumulated on top of the residual.
        acc = skip_ref[...]                               # (width, L) f32
        for t, (dy, dx) in enumerate(taps):
            s = (dy - 1) * Wo1 + (dx - 1)
            tap = hn
            if s:
                tap = pltpu.roll(tap, shift=(-s) % L, axis=1)
            acc = acc + jnp.dot(w1_ref[t], tap,
                                preferred_element_type=jnp.float32,
                                precision=precision)
        out_ref[...] = acc

    return kernel


# -------------------------------- wrapper ------------------------------------

def _round_up(x, m):
    return (x + m - 1) // m * m


@partial(jax.jit, static_argnames=("binarize", "mxu_dtype", "precision"))
def downsample_block_forward(x_nchw, w0, w1, binarize=False,
                             mxu_dtype=jnp.bfloat16, precision=None):
    """JAX/Pallas equivalent of DownsampleBlock.forward (x is NCHW, f32)."""
    if binarize:  # ForwardSign
        w0 = math.sqrt(2.0 / (w0.shape[1] * 9)) * jnp.sign(w0)
        w1 = math.sqrt(2.0 / (w1.shape[1] * 9)) * jnp.sign(w1)

    N, C, H, W = x_nchw.shape
    width = w1.shape[0]
    # TODO(synk): support odd H/W (parity planes become ragged).
    assert H % 2 == 0 and W % 2 == 0, "even spatial dims expected"
    Ho, Wo = H // 2, W // 2                     # 3x3, stride 2, pad 1
    Ho1, Wo1 = Ho + 1, Wo + 1                   # +1 guard row/col per image
    PLANE = Ho1 * Wo1
    Lp = N * PLANE
    L = _round_up(Lp, 128)                      # lane-dense, 128-aligned

    x = jnp.transpose(x_nchw, (0, 2, 3, 1)).astype(jnp.float32)     # NHWC

    # BatchNorm0 (batch stats, affine=False) + ReLU in the wrapper (cheap XLA
    # elementwise), then zero pad: padded taps contribute exactly 0.
    mu0 = jnp.mean(x, axis=(0, 1, 2), keepdims=True)
    var0 = jnp.mean((x - mu0) ** 2, axis=(0, 1, 2), keepdims=True)
    xn = jnp.maximum((x - mu0) * jax.lax.rsqrt(var0 + EPS), 0.0)
    xnp = jnp.pad(xn, ((0, 0), (1, 1), (1, 1), (0, 0)))             # (N,H+2,W+2,C)

    def lane_layout(a):                         # (N,Ho1,Wo1,Cany) -> (Cany, L)
        ch = a.shape[3]
        a = jnp.transpose(a, (3, 0, 1, 2)).reshape(ch, Lp)
        return jnp.pad(a, ((0, 0), (0, L - Lp)))

    # Four stride-2 parity planes: ~1x input bytes instead of a 9x im2col.
    planes = jnp.stack([lane_layout(xnp[:, a::2, b::2, :])
                        for a in range(2) for b in range(2)])        # (4,C,L)

    # Residual branch: avg_pool2d(x, 3, stride 2, pad 1, count_include_pad)
    # ++ zero channels, pre-formed in the (width, L) output layout.
    xrp = jnp.pad(x, ((0, 0), (1, 1), (1, 1), (0, 0)))
    xs = sum(xrp[:, dy:dy + 2 * Ho:2, dx:dx + 2 * Wo:2, :]
             for dy in range(3) for dx in range(3)) / 9.0            # (N,Ho,Wo,C)
    xs = jnp.pad(xs, ((0, 0), (0, 1), (0, 1), (0, 0)))               # guard row/col
    skip = jnp.concatenate([lane_layout(xs),
                            jnp.zeros((width - C, L), jnp.float32)], axis=0)

    # Per-tap weights: OIHW -> (9, O, I); tap order matches the kernel loop.
    w0t = jnp.transpose(w0, (2, 3, 0, 1)).reshape(9, width, C)
    w1t = jnp.transpose(w1, (2, 3, 0, 1)).reshape(9, width, width)

    # Validity mask (real pixel <=> lane < Lp, row < Ho, col < Wo), built here
    # so the kernel does no integer div/mod.
    lane = jnp.arange(L, dtype=jnp.int32)
    yo = (lane % PLANE) // Wo1
    xo = lane % Wo1
    mask = ((lane < Lp) & (yo < Ho) & (xo < Wo)).astype(jnp.float32)[None, :]

    kernel = make_fused_block_kernel(N, C, width, Ho, Wo, L, mxu_dtype, precision)
    outT = pl.pallas_call(
        kernel,
        out_shape=jax.ShapeDtypeStruct((width, L), jnp.float32),
        in_specs=[pl.BlockSpec(memory_space=pltpu.MemorySpace.VMEM)] * 5,
        out_specs=pl.BlockSpec(memory_space=pltpu.MemorySpace.VMEM),
        input_output_aliases={4: 0},            # residual buffer -> output
    )(planes.astype(mxu_dtype), w0t.astype(mxu_dtype), w1t.astype(mxu_dtype),
      mask, skip)

    out = outT[:, :Lp].reshape(width, N, Ho1, Wo1)[:, :, :Ho, :Wo]
    return jnp.transpose(out, (1, 0, 2, 3))     # NCHW


# -------------------------------- reference ----------------------------------

def reference_forward(x, w0, w1):
    hi = jax.lax.Precision.HIGHEST

    def bn(v):
        m = v.mean(axis=(0, 2, 3), keepdims=True)
        var = ((v - m) ** 2).mean(axis=(0, 2, 3), keepdims=True)
        return (v - m) * jax.lax.rsqrt(var + EPS)

    h = jax.lax.conv_general_dilated(
        jax.nn.relu(bn(x)), w0, (2, 2), ((1, 1), (1, 1)),
        dimension_numbers=('NCHW', 'OIHW', 'NCHW'), precision=hi)
    h = jax.lax.conv_general_dilated(
        jax.nn.relu(bn(h)), w1, (1, 1), ((1, 1), (1, 1)),
        dimension_numbers=('NCHW', 'OIHW', 'NCHW'), precision=hi)
    xs = jax.lax.reduce_window(
        x, 0.0, jax.lax.add, (1, 1, 3, 3), (1, 1, 2, 2),
        ((0, 0), (0, 0), (1, 1), (1, 1))) / 9.0
    xd = jnp.concatenate([xs, jnp.zeros_like(xs)], axis=1)
    return xd + h


# ---------------------------------- main --------------------------------------

if __name__ == "__main__":
    width = 8                                   # DownsampleBlock(width=8)
    key = jax.random.PRNGKey(0)
    kx, k0, k1 = jax.random.split(key, 3)

    # kaiming_normal_(mode='fan_out'): std = sqrt(2 / (out_channels * kh * kw))
    std = math.sqrt(2.0 / (width * 3 * 3))
    w0 = jax.random.normal(k0, (width, width // 2, 3, 3), jnp.float32) * std
    w1 = jax.random.normal(k1, (width, width, 3, 3), jnp.float32) * std
    x = jax.random.normal(kx, (2, width // 2, 16, 16), jnp.float32)   # NCHW

    ref = jax.block_until_ready(reference_forward(x, w0, w1))

    # f32 operand path: structural/semantic check.  Threshold leaves margin
    # for the MXU precision mode (f32 operands may still be rounded to bf16
    # passes at default precision); real layout/BN bugs are O(0.1-1).
    out_f32 = jax.block_until_ready(
        downsample_block_forward(x, w0, w1, mxu_dtype=jnp.float32))
    assert out_f32.shape == (2, width, 8, 8), out_f32.shape
    err_f32 = float(jnp.max(jnp.abs(out_f32 - ref)))
    assert err_f32 < 3e-2, err_f32

    # Default path: bf16 MXU inputs (halves activation/weight DMA on every
    # generation, f32 accumulation) — looser tolerance from operand rounding.
    out = jax.block_until_ready(downsample_block_forward(x, w0, w1))
    assert out.shape == (2, width, 8, 8), out.shape
    err_bf16 = float(jnp.max(jnp.abs(out - ref)))
    assert err_bf16 < 0.25, err_bf16

    print("KERNEL_OK")
</pallas_src>

<mosaic_0001>
module attributes {stable_mosaic.version = 11 : i64} {
  func.func @kernel(%arg0: memref<4x4x256xf32, #tpu.memory_space<vmem>>, %arg1: memref<9x8x4xf32, #tpu.memory_space<vmem>>, %arg2: memref<9x8x8xf32, #tpu.memory_space<vmem>>, %arg3: memref<1x256xf32, #tpu.memory_space<vmem>>, %arg4: memref<8x256xf32, #tpu.memory_space<vmem>>, %arg5: memref<8x256xf32, #tpu.memory_space<vmem>>) attributes {dimension_semantics = [], scalar_prefetch = 0 : i64, scratch_operands = 0 : i64, tpu.core_type = #tpu.core_type<tc>} {
    %c0 = arith.constant 0 : index
    %c0_0 = arith.constant 0 : index
    %c0_1 = arith.constant 0 : index
    %0 = vector.load %arg0[%c0, %c0_0, %c0_1] : memref<4x4x256xf32, #tpu.memory_space<vmem>>, vector<1x4x256xf32>
    %1 = vector.shape_cast %0 : vector<1x4x256xf32> to vector<4x256xf32>
    %c1 = arith.constant 1 : index
    %c0_2 = arith.constant 0 : index
    %c0_3 = arith.constant 0 : index
    %2 = vector.load %arg0[%c1, %c0_2, %c0_3] : memref<4x4x256xf32, #tpu.memory_space<vmem>>, vector<1x4x256xf32>
    %3 = vector.shape_cast %2 : vector<1x4x256xf32> to vector<4x256xf32>
    %c2 = arith.constant 2 : index
    %c0_4 = arith.constant 0 : index
    %c0_5 = arith.constant 0 : index
    %4 = vector.load %arg0[%c2, %c0_4, %c0_5] : memref<4x4x256xf32, #tpu.memory_space<vmem>>, vector<1x4x256xf32>
    %5 = vector.shape_cast %4 : vector<1x4x256xf32> to vector<4x256xf32>
    %c3 = arith.constant 3 : index
    %c0_6 = arith.constant 0 : index
    %c0_7 = arith.constant 0 : index
    %6 = vector.load %arg0[%c3, %c0_6, %c0_7] : memref<4x4x256xf32, #tpu.memory_space<vmem>>, vector<1x4x256xf32>
    %7 = vector.shape_cast %6 : vector<1x4x256xf32> to vector<4x256xf32>
    %cst = arith.constant 0.000000e+00 : f32
    %8 = vector.broadcast %cst : f32 to vector<8x256xf32>
    %c0_8 = arith.constant 0 : index
    %c0_9 = arith.constant 0 : index
    %c0_10 = arith.constant 0 : index
    %9 = vector.load %arg1[%c0_8, %c0_9, %c0_10] : memref<9x8x4xf32, #tpu.memory_space<vmem>>, vector<1x8x4xf32>
    %10 = vector.shape_cast %9 : vector<1x8x4xf32> to vector<8x4xf32>
    %cst_11 = arith.constant dense<0.000000e+00> : vector<8x256xf32>
    %11 = tpu.matmul %10, %1, %cst_11 {dimension_numbers = #tpu.dot_dimension_numbers<[1], [0], [0], [1], [0, 0, 1, 1], [], []>} : vector<8x4xf32>, vector<4x256xf32>, vector<8x256xf32> -> vector<8x256xf32>
    %12 = arith.addf %8, %11 : vector<8x256xf32>
    %c1_12 = arith.constant 1 : index
    %c0_13 = arith.constant 0 : index
    %c0_14 = arith.constant 0 : index
    %13 = vector.load %arg1[%c1_12, %c0_13, %c0_14] : memref<9x8x4xf32, #tpu.memory_space<vmem>>, vector<1x8x4xf32>
    %14 = vector.shape_cast %13 : vector<1x8x4xf32> to vector<8x4xf32>
    %cst_15 = arith.constant dense<0.000000e+00> : vector<8x256xf32>
    %15 = tpu.matmul %14, %3, %cst_15 {dimension_numbers = #tpu.dot_dimension_numbers<[1], [0], [0], [1], [0, 0, 1, 1], [], []>} : vector<8x4xf32>, vector<4x256xf32>, vector<8x256xf32> -> vector<8x256xf32>
    %16 = arith.addf %12, %15 : vector<8x256xf32>
    %c255_i32 = arith.constant 255 : i32
    %17 = tpu.dynamic_rotate %1 by %c255_i32 dim 1 : vector<4x256xf32>, i32 -> vector<4x256xf32>
    %c2_16 = arith.constant 2 : index
    %c0_17 = arith.constant 0 : index
    %c0_18 = arith.constant 0 : index
    %18 = vector.load %arg1[%c2_16, %c0_17, %c0_18] : memref<9x8x4xf32, #tpu.memory_space<vmem>>, vector<1x8x4xf32>
    %19 = vector.shape_cast %18 : vector<1x8x4xf32> to vector<8x4xf32>
    %cst_19 = arith.constant dense<0.000000e+00> : vector<8x256xf32>
    %20 = tpu.matmul %19, %17, %cst_19 {dimension_numbers = #tpu.dot_dimension_numbers<[1], [0], [0], [1], [0, 0, 1, 1], [], []>} : vector<8x4xf32>, vector<4x256xf32>, vector<8x256xf32> -> vector<8x256xf32>
    %21 = arith.addf %16, %20 : vector<8x256xf32>
    %c3_20 = arith.constant 3 : index
    %c0_21 = arith.constant 0 : index
    %c0_22 = arith.constant 0 : index
    %22 = vector.load %arg1[%c3_20, %c0_21, %c0_22] : memref<9x8x4xf32, #tpu.memory_space<vmem>>, vector<1x8x4xf32>
    %23 = vector.shape_cast %22 : vector<1x8x4xf32> to vector<8x4xf32>
    %cst_23 = arith.constant dense<0.000000e+00> : vector<8x256xf32>
    %24 = tpu.matmul %23, %5, %cst_23 {dimension_numbers = #tpu.dot_dimension_numbers<[1], [0], [0], [1], [0, 0, 1, 1], [], []>} : vector<8x4xf32>, vector<4x256xf32>, vector<8x256xf32> -> vector<8x256xf32>
    %25 = arith.addf %21, %24 : vector<8x256xf32>
    %c4 = arith.constant 4 : index
    %c0_24 = arith.constant 0 : index
    %c0_25 = arith.constant 0 : index
    %26 = vector.load %arg1[%c4, %c0_24, %c0_25] : memref<9x8x4xf32, #tpu.memory_space<vmem>>, vector<1x8x4xf32>
    %27 = vector.shape_cast %26 : vector<1x8x4xf32> to vector<8x4xf32>
    %cst_26 = arith.constant dense<0.000000e+00> : vector<8x256xf32>
    %28 = tpu.matmul %27, %7, %cst_26 {dimension_numbers = #tpu.dot_dimension_numbers<[1], [0], [0], [1], [0, 0, 1, 1], [], []>} : vector<8x4xf32>, vector<4x256xf32>, vector<8x256xf32> -> vector<8x256xf32>
    %29 = arith.addf %25, %28 : vector<8x256xf32>
    %c255_i32_27 = arith.constant 255 : i32
    %30 = tpu.dynamic_rotate %5 by %c255_i32_27 dim 1 : vector<4x256xf32>, i32 -> vector<4x256xf32>
    %c5 = arith.constant 5 : index
    %c0_28 = arith.constant 0 : index
    %c0_29 = arith.constant 0 : index
    %31 = vector.load %arg1[%c5, %c0_28, %c0_29] : memref<9x8x4xf32, #tpu.memory_space<vmem>>, vector<1x8x4xf32>
    %32 = vector.shape_cast %31 : vector<1x8x4xf32> to vector<8x4xf32>
    %cst_30 = arith.constant dense<0.000000e+00> : vector<8x256xf32>
    %33 = tpu.matmul %32, %30, %cst_30 {dimension_numbers = #tpu.dot_dimension_numbers<[1], [0], [0], [1], [0, 0, 1, 1], [], []>} : vector<8x4xf32>, vector<4x256xf32>, vector<8x256xf32> -> vector<8x256xf32>
    %34 = arith.addf %29, %33 : vector<8x256xf32>
    %c247_i32 = arith.constant 247 : i32
    %35 = tpu.dynamic_rotate %1 by %c247_i32 dim 1 : vector<4x256xf32>, i32 -> vector<4x256xf32>
    %c6 = arith.constant 6 : index
    %c0_31 = arith.constant 0 : index
    %c0_32 = arith.constant 0 : index
    %36 = vector.load %arg1[%c6, %c0_31, %c0_32] : memref<9x8x4xf32, #tpu.memory_space<vmem>>, vector<1x8x4xf32>
    %37 = vector.shape_cast %36 : vector<1x8x4xf32> to vector<8x4xf32>
    %cst_33 = arith.constant dense<0.000000e+00> : vector<8x256xf32>
    %38 = tpu.matmul %37, %35, %cst_33 {dimension_numbers = #tpu.dot_dimension_numbers<[1], [0], [0], [1], [0, 0, 1, 1], [], []>} : vector<8x4xf32>, vector<4x256xf32>, vector<8x256xf32> -> vector<8x256xf32>
    %39 = arith.addf %34, %38 : vector<8x256xf32>
    %c247_i32_34 = arith.constant 247 : i32
    %40 = tpu.dynamic_rotate %3 by %c247_i32_34 dim 1 : vector<4x256xf32>, i32 -> vector<4x256xf32>
    %c7 = arith.constant 7 : index
    %c0_35 = arith.constant 0 : index
    %c0_36 = arith.constant 0 : index
    %41 = vector.load %arg1[%c7, %c0_35, %c0_36] : memref<9x8x4xf32, #tpu.memory_space<vmem>>, vector<1x8x4xf32>
    %42 = vector.shape_cast %41 : vector<1x8x4xf32> to vector<8x4xf32>
    %cst_37 = arith.constant dense<0.000000e+00> : vector<8x256xf32>
    %43 = tpu.matmul %42, %40, %cst_37 {dimension_numbers = #tpu.dot_dimension_numbers<[1], [0], [0], [1], [0, 0, 1, 1], [], []>} : vector<8x4xf32>, vector<4x256xf32>, vector<8x256xf32> -> vector<8x256xf32>
    %44 = arith.addf %39, %43 : vector<8x256xf32>
    %c246_i32 = arith.constant 246 : i32
    %45 = tpu.dynamic_rotate %1 by %c246_i32 dim 1 : vector<4x256xf32>, i32 -> vector<4x256xf32>
    %c8 = arith.constant 8 : index
    %c0_38 = arith.constant 0 : index
    %c0_39 = arith.constant 0 : index
    %46 = vector.load %arg1[%c8, %c0_38, %c0_39] : memref<9x8x4xf32, #tpu.memory_space<vmem>>, vector<1x8x4xf32>
    %47 = vector.shape_cast %46 : vector<1x8x4xf32> to vector<8x4xf32>
    %cst_40 = arith.constant dense<0.000000e+00> : vector<8x256xf32>
    %48 = tpu.matmul %47, %45, %cst_40 {dimension_numbers = #tpu.dot_dimension_numbers<[1], [0], [0], [1], [0, 0, 1, 1], [], []>} : vector<8x4xf32>, vector<4x256xf32>, vector<8x256xf32> -> vector<8x256xf32>
    %49 = arith.addf %44, %48 : vector<8x256xf32>
    %c0_41 = arith.constant 0 : index
    %c0_42 = arith.constant 0 : index
    %50 = vector.load %arg3[%c0_41, %c0_42] : memref<1x256xf32, #tpu.memory_space<vmem>>, vector<1x256xf32>
    %51 = vector.broadcast %50 : vector<1x256xf32> to vector<8x256xf32>
    %52 = arith.mulf %49, %51 : vector<8x256xf32>
    %cst_43 = arith.constant dense<0.000000e+00> : vector<8xf32>
    %53 = vector.multi_reduction <add>, %52, %cst_43 [1] : vector<8x256xf32> to vector<8xf32>
    %54 = vector.shape_cast %53 : vector<8xf32> to vector<8x1xf32>
    %55 = arith.mulf %52, %52 : vector<8x256xf32>
    %cst_44 = arith.constant dense<0.000000e+00> : vector<8xf32>
    %56 = vector.multi_reduction <add>, %55, %cst_44 [1] : vector<8x256xf32> to vector<8xf32>
    %57 = vector.shape_cast %56 : vector<8xf32> to vector<8x1xf32>
    %cst_45 = arith.constant 7.812500e-03 : f32
    %58 = vector.broadcast %cst_45 : f32 to vector<8x1xf32>
    %59 = arith.mulf %54, %58 : vector<8x1xf32>
    %cst_46 = arith.constant 7.812500e-03 : f32
    %60 = vector.broadcast %cst_46 : f32 to vector<8x1xf32>
    %61 = arith.mulf %57, %60 : vector<8x1xf32>
    %62 = arith.mulf %59, %59 : vector<8x1xf32>
    %63 = arith.subf %61, %62 : vector<8x1xf32>
    %64 = vector.broadcast %59 : vector<8x1xf32> to vector<8x256xf32>
    %65 = arith.subf %49, %64 : vector<8x256xf32>
    %cst_47 = arith.constant 9.99999974E-6 : f32
    %66 = vector.broadcast %cst_47 : f32 to vector<8x1xf32>
    %67 = arith.addf %63, %66 : vector<8x1xf32>
    %68 = math.rsqrt %67 : vector<8x1xf32>
    %69 = vector.broadcast %68 : vector<8x1xf32> to vector<8x256xf32>
    %70 = arith.mulf %65, %69 : vector<8x256xf32>
    %cst_48 = arith.constant 0.000000e+00 : f32
    %71 = vector.broadcast %cst_48 : f32 to vector<8x256xf32>
    %72 = arith.maximumf %70, %71 : vector<8x256xf32>
    %73 = vector.broadcast %50 : vector<1x256xf32> to vector<8x256xf32>
    %74 = arith.mulf %72, %73 : vector<8x256xf32>
    %c0_49 = arith.constant 0 : index
    %c0_50 = arith.constant 0 : index
    %75 = vector.load %arg4[%c0_49, %c0_50] : memref<8x256xf32, #tpu.memory_space<vmem>>, vector<8x256xf32>
    %c10_i32 = arith.constant 10 : i32
    %76 = tpu.dynamic_rotate %74 by %c10_i32 dim 1 : vector<8x256xf32>, i32 -> vector<8x256xf32>
    %c0_51 = arith.constant 0 : index
    %c0_52 = arith.constant 0 : index
    %c0_53 = arith.constant 0 : index
    %77 = vector.load %arg2[%c0_51, %c0_52, %c0_53] : memref<9x8x8xf32, #tpu.memory_space<vmem>>, vector<1x8x8xf32>
    %78 = vector.shape_cast %77 : vector<1x8x8xf32> to vector<8x8xf32>
    %cst_54 = arith.constant dense<0.000000e+00> : vector<8x256xf32>
    %79 = tpu.matmul %78, %76, %cst_54 {dimension_numbers = #tpu.dot_dimension_numbers<[1], [0], [0], [1], [0, 0, 1, 1], [], []>} : vector<8x8xf32>, vector<8x256xf32>, vector<8x256xf32> -> vector<8x256xf32>
    %80 = arith.addf %75, %79 : vector<8x256xf32>
    %c9_i32 = arith.constant 9 : i32
    %81 = tpu.dynamic_rotate %74 by %c9_i32 dim 1 : vector<8x256xf32>, i32 -> vector<8x256xf32>
    %c1_55 = arith.constant 1 : index
    %c0_56 = arith.constant 0 : index
    %c0_57 = arith.constant 0 : index
    %82 = vector.load %arg2[%c1_55, %c0_56, %c0_57] : memref<9x8x8xf32, #tpu.memory_space<vmem>>, vector<1x8x8xf32>
    %83 = vector.shape_cast %82 : vector<1x8x8xf32> to vector<8x8xf32>
    %cst_58 = arith.constant dense<0.000000e+00> : vector<8x256xf32>
    %84 = tpu.matmul %83, %81, %cst_58 {dimension_numbers = #tpu.dot_dimension_numbers<[1], [0], [0], [1], [0, 0, 1, 1], [], []>} : vector<8x8xf32>, vector<8x256xf32>, vector<8x256xf32> -> vector<8x256xf32>
    %85 = arith.addf %80, %84 : vector<8x256xf32>
    %c8_i32 = arith.constant 8 : i32
    %86 = tpu.dynamic_rotate %74 by %c8_i32 dim 1 : vector<8x256xf32>, i32 -> vector<8x256xf32>
    %c2_59 = arith.constant 2 : index
    %c0_60 = arith.constant 0 : index
    %c0_61 = arith.constant 0 : index
    %87 = vector.load %arg2[%c2_59, %c0_60, %c0_61] : memref<9x8x8xf32, #tpu.memory_space<vmem>>, vector<1x8x8xf32>
    %88 = vector.shape_cast %87 : vector<1x8x8xf32> to vector<8x8xf32>
    %cst_62 = arith.constant dense<0.000000e+00> : vector<8x256xf32>
    %89 = tpu.matmul %88, %86, %cst_62 {dimension_numbers = #tpu.dot_dimension_numbers<[1], [0], [0], [1], [0, 0, 1, 1], [], []>} : vector<8x8xf32>, vector<8x256xf32>, vector<8x256xf32> -> vector<8x256xf32>
    %90 = arith.addf %85, %89 : vector<8x256xf32>
    %c1_i32 = arith.constant 1 : i32
    %91 = tpu.dynamic_rotate %74 by %c1_i32 dim 1 : vector<8x256xf32>, i32 -> vector<8x256xf32>
    %c3_63 = arith.constant 3 : index
    %c0_64 = arith.constant 0 : index
    %c0_65 = arith.constant 0 : index
    %92 = vector.load %arg2[%c3_63, %c0_64, %c0_65] : memref<9x8x8xf32, #tpu.memory_space<vmem>>, vector<1x8x8xf32>
    %93 = vector.shape_cast %92 : vector<1x8x8xf32> to vector<8x8xf32>
    %cst_66 = arith.constant dense<0.000000e+00> : vector<8x256xf32>
    %94 = tpu.matmul %93, %91, %cst_66 {dimension_numbers = #tpu.dot_dimension_numbers<[1], [0], [0], [1], [0, 0, 1, 1], [], []>} : vector<8x8xf32>, vector<8x256xf32>, vector<8x256xf32> -> vector<8x256xf32>
    %95 = arith.addf %90, %94 : vector<8x256xf32>
    %c4_67 = arith.constant 4 : index
    %c0_68 = arith.constant 0 : index
    %c0_69 = arith.constant 0 : index
    %96 = vector.load %arg2[%c4_67, %c0_68, %c0_69] : memref<9x8x8xf32, #tpu.memory_space<vmem>>, vector<1x8x8xf32>
    %97 = vector.shape_cast %96 : vector<1x8x8xf32> to vector<8x8xf32>
    %cst_70 = arith.constant dense<0.000000e+00> : vector<8x256xf32>
    %98 = tpu.matmul %97, %74, %cst_70 {dimension_numbers = #tpu.dot_dimension_numbers<[1], [0], [0], [1], [0, 0, 1, 1], [], []>} : vector<8x8xf32>, vector<8x256xf32>, vector<8x256xf32> -> vector<8x256xf32>
    %99 = arith.addf %95, %98 : vector<8x256xf32>
    %c255_i32_71 = arith.constant 255 : i32
    %100 = tpu.dynamic_rotate %74 by %c255_i32_71 dim 1 : vector<8x256xf32>, i32 -> vector<8x256xf32>
    %c5_72 = arith.constant 5 : index
    %c0_73 = arith.constant 0 : index
    %c0_74 = arith.constant 0 : index
    %101 = vector.load %arg2[%c5_72, %c0_73, %c0_74] : memref<9x8x8xf32, #tpu.memory_space<vmem>>, vector<1x8x8xf32>
    %102 = vector.shape_cast %101 : vector<1x8x8xf32> to vector<8x8xf32>
    %cst_75 = arith.constant dense<0.000000e+00> : vector<8x256xf32>
    %103 = tpu.matmul %102, %100, %cst_75 {dimension_numbers = #tpu.dot_dimension_numbers<[1], [0], [0], [1], [0, 0, 1, 1], [], []>} : vector<8x8xf32>, vector<8x256xf32>, vector<8x256xf32> -> vector<8x256xf32>
    %104 = arith.addf %99, %103 : vector<8x256xf32>
    %c248_i32 = arith.constant 248 : i32
    %105 = tpu.dynamic_rotate %74 by %c248_i32 dim 1 : vector<8x256xf32>, i32 -> vector<8x256xf32>
    %c6_76 = arith.constant 6 : index
    %c0_77 = arith.constant 0 : index
    %c0_78 = arith.constant 0 : index
    %106 = vector.load %arg2[%c6_76, %c0_77, %c0_78] : memref<9x8x8xf32, #tpu.memory_space<vmem>>, vector<1x8x8xf32>
    %107 = vector.shape_cast %106 : vector<1x8x8xf32> to vector<8x8xf32>
    %cst_79 = arith.constant dense<0.000000e+00> : vector<8x256xf32>
    %108 = tpu.matmul %107, %105, %cst_79 {dimension_numbers = #tpu.dot_dimension_numbers<[1], [0], [0], [1], [0, 0, 1, 1], [], []>} : vector<8x8xf32>, vector<8x256xf32>, vector<8x256xf32> -> vector<8x256xf32>
    %109 = arith.addf %104, %108 : vector<8x256xf32>
    %c247_i32_80 = arith.constant 247 : i32
    %110 = tpu.dynamic_rotate %74 by %c247_i32_80 dim 1 : vector<8x256xf32>, i32 -> vector<8x256xf32>
    %c7_81 = arith.constant 7 : index
    %c0_82 = arith.constant 0 : index
    %c0_83 = arith.constant 0 : index
    %111 = vector.load %arg2[%c7_81, %c0_82, %c0_83] : memref<9x8x8xf32, #tpu.memory_space<vmem>>, vector<1x8x8xf32>
    %112 = vector.shape_cast %111 : vector<1x8x8xf32> to vector<8x8xf32>
    %cst_84 = arith.constant dense<0.000000e+00> : vector<8x256xf32>
    %113 = tpu.matmul %112, %110, %cst_84 {dimension_numbers = #tpu.dot_dimension_numbers<[1], [0], [0], [1], [0, 0, 1, 1], [], []>} : vector<8x8xf32>, vector<8x256xf32>, vector<8x256xf32> -> vector<8x256xf32>
    %114 = arith.addf %109, %113 : vector<8x256xf32>
    %c246_i32_85 = arith.constant 246 : i32
    %115 = tpu.dynamic_rotate %74 by %c246_i32_85 dim 1 : vector<8x256xf32>, i32 -> vector<8x256xf32>
    %c8_86 = arith.constant 8 : index
    %c0_87 = arith.constant 0 : index
    %c0_88 = arith.constant 0 : index
    %116 = vector.load %arg2[%c8_86, %c0_87, %c0_88] : memref<9x8x8xf32, #tpu.memory_space<vmem>>, vector<1x8x8xf32>
    %117 = vector.shape_cast %116 : vector<1x8x8xf32> to vector<8x8xf32>
    %cst_89 = arith.constant dense<0.000000e+00> : vector<8x256xf32>
    %118 = tpu.matmul %117, %115, %cst_89 {dimension_numbers = #tpu.dot_dimension_numbers<[1], [0], [0], [1], [0, 0, 1, 1], [], []>} : vector<8x8xf32>, vector<8x256xf32>, vector<8x256xf32> -> vector<8x256xf32>
    %119 = arith.addf %114, %118 : vector<8x256xf32>
    %c0_90 = arith.constant 0 : index
    %c0_91 = arith.constant 0 : index
    %120 = vector.load %arg5[%c0_90, %c0_91] : memref<8x256xf32, #tpu.memory_space<vmem>>, vector<8x256xf32>
    tpu.vector_store %arg5[%c0_90, %c0_91], %119 {strides = array<i32>} : memref<8x256xf32, #tpu.memory_space<vmem>>, vector<8x256xf32>,
    return
  }
}

</mosaic_0001>

<bundles_post_ra>
// kernel: downsample_block_forward.1
= control target key start
LH: loop header
LB: loop body
LE: loop exit
PB: predicated region body
PF: predicated region fallthrough
CT: control target
= control target key end

     0   :  { %vm36_vm0 = vcmask 1043456   ;;  %v1721_v3 = vmov 0.0   ;;  %s1722_s24 = smov 127   ;;  %vm32_vm1 = vcmask 31744   ;;  %s1723_s27 = smov 119   ;;  %v197_v9 = vlaneseq  ;;  %s1964_s0 = inlined_call_operand.vmem [shape: f32[4,4,256], index: 0, kind: input, shape index: {}]   ;;  %s1965_s1 = inlined_call_operand.vmem [shape: f32[9,8,4], index: 1, kind: input, shape index: {}]   ;;  %s1966_s3 = inlined_call_operand.vmem [shape: f32[1,256], index: 3, kind: input, shape index: {}]   ;;  %s1967_s2 = inlined_call_operand.vmem [shape: f32[9,8,8], index: 2, kind: input, shape index: {}]   ;;  %s1968_s4 = inlined_call_operand.vmem [shape: f32[8,256], index: 4, kind: input, shape index: {}, may-alias: {4,5}]   ;;  %s1969_s5 = inlined_call_operand.vmem [shape: f32[8,256], index: 5, kind: output, shape index: {}, may-alias: {4,5}]  }
   0x1   :  { %v20_v0 = vld [vmem:[%s1964_s0] sm:$0xff]  ;;  %v1618_v1 = vld [vmem:[%s1964_s0 + $0x10] sm:$0xff]  ;;  %v1617_v2 = vld [vmem:[%s1964_s0 + $0x8] sm:$0xff]  ;;  %105 = vmatprep.mubr.f32.mxu0 %v1721_v3  ;;  %932 = vmatprep.mubr.f32.mxu1 %v1721_v3  ;;  %s1724_s30 = smov 118   ;;  %s1727_s23 = smov 8   ;;  %vm864_vm6 = vcmask 64512  }
   0x2   :  { %193 = vrot.lane.b32.xlu0 %v20_v0, %s1722_s24  ;;  %v113_v4 = vcombine.high %v20_v0, %v20_v0  ;;  %455 = vrot.lane.b32.xlu1 %v1618_v1, %s1722_s24  ;;  %v289_v5 = vcombine.high %v1618_v1, %v1618_v1  ;;  %v31_v6 = vcombine.high %v1617_v2, %v1617_v2  ;;  %v1620_v7 = vld [vmem:[%s1965_s1 + $0x8] sm:$0xff]  ;;  %v27_v8 = vld [vmem:[%s1965_s1] sm:$0xff]  ;;  %v1795_v10 = vand.u32 127, %v197_v9  ;;  %s1728_s25 = smov 1   ;;  %s1729_s26 = smov 120  }
   0x3   :  { %v1619_v12 = vld [vmem:[%s1964_s0 + $0x18] sm:$0xff]  ;;  %v1627_v16 = vld [vmem:[%s1965_s1 + $0x10] sm:$0xff]  ;;  %v1635_v24 = vld [vmem:[%s1965_s1 + $0x20] sm:$0xff]  ;;  %v821_v40 = vshrl.u32 %v197_v9, 7 }
   0x4   :  { %1621 = vmatprep.subr.msk.mxu0 %vm36_vm0, %v31_v6  ;;  %vm199_vm2 = vcmp.lt.s32.totalorder %v1795_v10, 127  ;;  %v373_v18 = vcombine.high %v1619_v12, %v1619_v12  ;;  %v1631_v20 = vld [vmem:[%s1965_s1 + $0x18] sm:$0xff]  ;;  %vm549_vm3 = vcmp.lt.s32.totalorder %v1795_v10, 119  ;;  %v1639_v29 = vld [vmem:[%s1965_s1 + $0x28] sm:$0xff]  ;;  %vm731_vm4 = vcmp.lt.s32.totalorder %v1795_v10, 118  ;;  %v1643_v34 = vld [vmem:[%s1965_s1 + $0x30] sm:$0xff] }
   0x5   :  { %1622 = vmatpush1.msk.msra.mxu0 %vm36_vm0, %v1617_v2  ;;  %v1647_v37 = vld [vmem:[%s1965_s1 + $0x38] sm:$0xff]  ;;  %v1651_v39 = vld [vmem:[%s1965_s1 + $0x40] sm:$0xff]  ;;  %v822_v41 = vsub.s32 0, %v821_v40  ;;  %v826_v43 = vsub.s32 1, %v821_v40  ;;  %s1725_s1 = smov 10   ;;  %vm860_vm5 = vcmp.lt.s32.totalorder %v1795_v10, 10 }
   0x6   :  { %195 = vrot.lane.b32.xlu0 %v113_v4, %s1722_s24  ;;  %457 = vrot.lane.b32.xlu1 %v289_v5, %s1722_s24  ;;  %v818_v42 = vld [vmem:[%s1966_s3] sm:$0x3]  ;;  %s1726_s3 = smov 9   ;;  %vm945_vm7 = vcmp.lt.s32.totalorder %v1795_v10, 9  ;;  %vm1030_vm8 = vcmp.lt.s32.totalorder %v1795_v10, 8  ;;  %vm1115_vm9 = vcmp.lt.s32.totalorder %v1795_v10, 1 }
   0x7   :  { %1623 = vmatmul.mubr.msk.f32.vlgmr.msra.gmra.mrb[0].mxu0 %vm32_vm1, %v1620_v7  ;;  %1624 = vmatprep.subr.msk.mxu0 %vm36_vm0, %v113_v4  ;;  %v823_v44 = vrot.slane %v818_v42, %v822_v41  ;;  %v827_v45 = vrot.slane %v818_v42, %v826_v43  ;;  %vm1362_vm10 = vcmp.lt.s32.totalorder %v1795_v10, 120  ;;  %v1666_v41 = vld [vmem:[%s1967_s2 + $0x30] sm:$0xff]  ;;  %v855_v10 = vld [vmem:[%s1968_s4 + $0x8] sm:$0xff] }
   0x8   :  { %1625 = vmatpush1.msk.msra.mxu0 %vm36_vm0, %v20_v0  ;;  %185 = vmatprep.mubr.f32.mxu0 %v1721_v3 }
   0xa   :  { %547 = vrot.lane.b32.xlu1 %v113_v4, %s1723_s27  ;;  %545 = vrot.lane.b32.xlu0 %v20_v0, %s1723_s27 }
   0xe   :  { %639 = vrot.lane.b32.xlu1 %v31_v6, %s1723_s27  ;;  %637 = vrot.lane.b32.xlu0 %v1617_v2, %s1723_s27 }
   0xf   :  { %1626 = vmatmul.mubr.msk.f32.vlgmr.msra.gmra.mrb[0].mxu0 %vm32_vm1, %v27_v8 }
  0x10   :  { %277 = vmatprep.mubr.f32.mxu0 %v1721_v3 }
  0x12   :  { %729 = vrot.lane.b32.xlu1 %v113_v4, %s1724_s30  ;;  %727 = vrot.lane.b32.xlu0 %v20_v0, %s1724_s30 }
  0x74   :  { %v194_v11 = vpop.permute.xlu0 %193  ;;  %v456_v17 = vpop.permute.xlu1 %455 }
  0x78   :  { %v196_v13 = vpop.permute.xlu0 %195  ;;  %v458_v19 = vpop.permute.xlu1 %457 }
  0x79   :  { %v200_v14 = vsel %vm199_vm2, %v194_v11, %v196_v13  ;;  %v201_v15 = vsel %vm199_vm2, %v196_v13, %v194_v11  ;;  %v460_v21 = vsel %vm199_vm2, %v458_v19, %v456_v17  ;;  %v459_v25 = vsel %vm199_vm2, %v456_v17, %v458_v19 }
  0x7a   :  { %1628 = vmatprep.subr.msk.mxu0 %vm36_vm0, %v201_v15 }
  0x7b   :  { %1629 = vmatpush1.msk.msra.mxu0 %vm36_vm0, %v200_v14 }
  0x7c   :  { %1630 = vmatmul.mubr.msk.f32.vlgmr.msra.gmra.mrb[0].mxu0 %vm32_vm1, %v1627_v16  ;;  %1632 = vmatprep.subr.msk.mxu0 %vm36_vm0, %v289_v5  ;;  %v548_v22 = vpop.permute.xlu1 %547  ;;  %v546_v23 = vpop.permute.xlu0 %545 }
  0x7d   :  { %1633 = vmatpush1.msk.msra.mxu0 %vm36_vm0, %v1618_v1  ;;  %361 = vmatprep.mubr.f32.mxu0 %v1721_v3  ;;  %v551_v26 = vsel %vm549_vm3, %v548_v22, %v546_v23  ;;  %v550_v30 = vsel %vm549_vm3, %v546_v23, %v548_v22 }
  0x7e   :  { %1636 = vmatprep.subr.msk.mxu0 %vm36_vm0, %v373_v18 }
  0x80   :  { %v640_v27 = vpop.permute.xlu1 %639  ;;  %v638_v28 = vpop.permute.xlu0 %637 }
  0x81   :  { %v642_v31 = vsel %vm549_vm3, %v640_v27, %v638_v28  ;;  %v641_v35 = vsel %vm549_vm3, %v638_v28, %v640_v27  ;;  %v1660_v27 = vld [vmem:[%s1967_s2 + $0x18] sm:$0xff] }
  0x84   :  { %1634 = vmatmul.mubr.msk.f32.vlgmr.msra.gmra.mrb[0].mxu0 %vm32_vm1, %v1631_v20  ;;  %v730_v32 = vpop.permute.xlu1 %729  ;;  %v728_v33 = vpop.permute.xlu0 %727  ;;  %v1656_v20 = vld [vmem:[%s1967_s2 + $0x8] sm:$0xff] }
  0x85   :  { %1637 = vmatpush1.msk.msra.mxu0 %vm36_vm0, %v1619_v12  ;;  %445 = vmatprep.mubr.f32.mxu0 %v1721_v3  ;;  %v733_v36 = vsel %vm731_vm4, %v730_v32, %v728_v33  ;;  %v732_v38 = vsel %vm731_vm4, %v728_v33, %v730_v32  ;;  %v863_v12 = vld [vmem:[%s1967_s2] sm:$0xff] }
  0x86   :  { %1640 = vmatprep.subr.msk.mxu0 %vm36_vm0, %v460_v21 }
  0x8c   :  { %1638 = vmatmul.mubr.msk.f32.vlgmr.msra.gmra.mrb[0].mxu0 %vm32_vm1, %v1635_v24 }
  0x8d   :  { %1641 = vmatpush1.msk.msra.mxu0 %vm36_vm0, %v459_v25  ;;  %536 = vmatprep.mubr.f32.mxu0 %v1721_v3  ;;  %v1658_v25 = vld [vmem:[%s1967_s2 + $0x10] sm:$0xff] }
  0x8e   :  { %1644 = vmatprep.subr.msk.mxu0 %vm36_vm0, %v551_v26 }
  0x94   :  { %1642 = vmatmul.mubr.msk.f32.vlgmr.msra.gmra.mrb[0].mxu0 %vm32_vm1, %v1639_v29 }
  0x95   :  { %1645 = vmatpush1.msk.msra.mxu0 %vm36_vm0, %v550_v30  ;;  %627 = vmatprep.mubr.f32.mxu0 %v1721_v3 }
  0x96   :  { %1648 = vmatprep.subr.msk.mxu0 %vm36_vm0, %v642_v31  ;;  %v1662_v31 = vld [vmem:[%s1967_s2 + $0x20] sm:$0xff] }
  0x9c   :  { %1646 = vmatmul.mubr.msk.f32.vlgmr.msra.gmra.mrb[0].mxu0 %vm32_vm1, %v1643_v34 }
  0x9d   :  { %1649 = vmatpush1.msk.msra.mxu0 %vm36_vm0, %v641_v35  ;;  %718 = vmatprep.mubr.f32.mxu0 %v1721_v3 }
  0x9e   :  { %1652 = vmatprep.subr.msk.mxu0 %vm36_vm0, %v733_v36  ;;  %v1664_v36 = vld [vmem:[%s1967_s2 + $0x28] sm:$0xff] }
  0xa4   :  { %1650 = vmatmul.mubr.msk.f32.vlgmr.msra.gmra.mrb[0].mxu0 %vm32_vm1, %v1647_v37 }
  0xa5   :  { %1653 = vmatpush1.msk.msra.mxu0 %vm36_vm0, %v732_v38  ;;  %809 = vmatprep.mubr.f32.mxu0 %v1721_v3 }
  0xac   :  { %1654 = vmatmul.mubr.msk.f32.vlgmr.msra.gmra.mrb[0].mxu0 %vm32_vm1, %v1651_v39 }
 0x17f   :  { %v811_v46 = vpop.f32.mrb[0].mxu0 }
 0x180   :  { %v830_v47 = vmul.f32 %v823_v44, %v811_v46  ;;  %v813_v48 = vpop.f32.mrb[1].mxu0 }
 0x181   :  { %v831_v49 = vmul.f32 %v827_v45, %v813_v48 }
 0x182   :  { %v835_v50 = vmul.f32 %v830_v47, %v830_v47 }
 0x183   :  { %v836_v51 = vmul.f32 %v831_v49, %v831_v49  ;;  %v832_v52 = vadd.f32 %v831_v49, %v830_v47  ;;  %v854_v49 = vld [vmem:[%s1968_s4] sm:$0xff] }
 0x185   :  { %833 = vadd.xlane.f32.xlu0 %v832_v52  ;;  %v837_v53 = vadd.f32 %v836_v51, %v835_v50 }
 0x187   :  { %838 = vadd.xlane.f32.xlu1 %v837_v53 }
 0x212   :  { %v834_v54 = vpop.xlane.xlu0 %833 }
 0x213   :  { %v840_v55 = vmul.f32 0.0078125, %v834_v54 }
 0x214   :  { %v839_v56 = vpop.xlane.xlu1 %838 }
 0x215   :  { %v841_v57 = vmul.f32 0.0078125, %v839_v56  ;;  %v842_v58 = vmul.f32 %v840_v55, %v840_v55  ;;  %v844_v61 = vsub.f32 %v811_v46, %v840_v55  ;;  %v845_v62 = vsub.f32 %v813_v48, %v840_v55  ;;  %v1668_v46 = vld [vmem:[%s1967_s2 + $0x38] sm:$0xff]  ;;  %v1670_v48 = vld [vmem:[%s1967_s2 + $0x40] sm:$0xff] }
 0x217   :  { %v843_v59 = vsub.f32 %v841_v57, %v842_v58 }
 0x219   :  { %v846_v60 = vadd.f32 1e-05, %v843_v59 }
 0x21b   :  { %1719 = vrsqrt.f32 %v846_v60 }
 0x225   :  { %v1720_v63 = vpop.eup %1719 }
 0x226   :  { %v848_v0 = vmul.f32 %v1720_v63, %v844_v61  ;;  %v849_v1 = vmul.f32 %v1720_v63, %v845_v62 }
 0x228   :  { %v850_v2 = vmax.f32 %v848_v0, 0.0  ;;  %v851_v4 = vmax.f32 %v849_v1, 0.0 }
 0x22a   :  { %v1874_v5 = vmul.f32 %v850_v2, %v823_v44  ;;  %v853_v6 = vmul.f32 %v851_v4, %v827_v45 }
 0x22c   :  { %858 = vrot.lane.b32.xlu1 %v853_v6, %s1725_s1  ;;  %856 = vrot.lane.b32.xlu0 %v1874_v5, %s1725_s1 }
 0x230   :  { %943 = vrot.lane.b32.xlu1 %v853_v6, %s1726_s3  ;;  %941 = vrot.lane.b32.xlu0 %v1874_v5, %s1726_s3 }
 0x234   :  { %1028 = vrot.lane.b32.xlu1 %v853_v6, %s1727_s23  ;;  %1026 = vrot.lane.b32.xlu0 %v1874_v5, %s1727_s23 }
 0x238   :  { %1113 = vrot.lane.b32.xlu1 %v853_v6, %s1728_s25  ;;  %1111 = vrot.lane.b32.xlu0 %v1874_v5, %s1728_s25 }
 0x23c   :  { %1276 = vrot.lane.b32.xlu1 %v853_v6, %s1722_s24  ;;  %1274 = vrot.lane.b32.xlu0 %v1874_v5, %s1722_s24 }
 0x240   :  { %1360 = vrot.lane.b32.xlu1 %v853_v6, %s1729_s26  ;;  %1358 = vrot.lane.b32.xlu0 %v1874_v5, %s1729_s26 }
 0x244   :  { %1445 = vrot.lane.b32.xlu1 %v853_v6, %s1723_s27  ;;  %1443 = vrot.lane.b32.xlu0 %v1874_v5, %s1723_s27 }
 0x248   :  { %1529 = vrot.lane.b32.xlu1 %v853_v6, %s1724_s30  ;;  %1527 = vrot.lane.b32.xlu0 %v1874_v5, %s1724_s30 }
 0x29e   :  { %v859_v7 = vpop.permute.xlu1 %858  ;;  %v857_v8 = vpop.permute.xlu0 %856 }
 0x29f   :  { %v861_v9 = vsel %vm860_vm5, %v857_v8, %v859_v7  ;;  %v862_v11 = vsel %vm860_vm5, %v859_v7, %v857_v8 }
 0x2a0   :  { %868 = vmatprep.subr.mxu1 %v861_v9 }
 0x2a1   :  { %869 = vmatpush1.msra.mxu1 %v862_v11 }
 0x2a2   :  { %v944_v13 = vpop.permute.xlu1 %943  ;;  %1655 = vmatmul.mubr.msk.f32.vlgmr.msra.gmra.mrb[0].mxu1 %vm864_vm6, %v863_v12  ;;  %v942_v14 = vpop.permute.xlu0 %941 }
 0x2a3   :  { %v947_v15 = vsel %vm945_vm7, %v944_v13, %v942_v14  ;;  %v946_v16 = vsel %vm945_vm7, %v942_v14, %v944_v13  ;;  %1017 = vmatprep.mubr.f32.mxu1 %v1721_v3 }
 0x2a4   :  { %953 = vmatprep.subr.mxu1 %v946_v16 }
 0x2a5   :  { %954 = vmatpush1.msra.mxu1 %v947_v15 }
 0x2a6   :  { %v1029_v17 = vpop.permute.xlu1 %1028  ;;  %v1027_v18 = vpop.permute.xlu0 %1026 }
 0x2a7   :  { %v1031_v19 = vsel %vm1030_vm8, %v1027_v18, %v1029_v17  ;;  %v1032_v21 = vsel %vm1030_vm8, %v1029_v17, %v1027_v18 }
 0x2a8   :  { %1038 = vmatprep.subr.mxu1 %v1031_v19 }
 0x2aa   :  { %v1114_v22 = vpop.permute.xlu1 %1113  ;;  %1657 = vmatmul.mubr.msk.f32.vlgmr.msra.gmra.mrb[0].mxu1 %vm864_vm6, %v1656_v20  ;;  %v1112_v23 = vpop.permute.xlu0 %1111 }
 0x2ab   :  { %1039 = vmatpush1.msra.mxu1 %v1032_v21  ;;  %v1116_v24 = vsel %vm1115_vm9, %v1112_v23, %v1114_v22  ;;  %1102 = vmatprep.mubr.f32.mxu1 %v1721_v3  ;;  %v1117_v26 = vsel %vm1115_vm9, %v1114_v22, %v1112_v23 }
 0x2ac   :  { %1123 = vmatprep.subr.mxu1 %v1116_v24 }
 0x2ae   :  { %v1277_v28 = vpop.permute.xlu1 %1276  ;;  %v1275_v29 = vpop.permute.xlu0 %1274 }
 0x2af   :  { %v1279_v30 = vsel %vm199_vm2, %v1277_v28, %v1275_v29  ;;  %v1278_v34 = vsel %vm199_vm2, %v1275_v29, %v1277_v28 }
 0x2b2   :  { %1659 = vmatmul.mubr.msk.f32.vlgmr.msra.gmra.mrb[0].mxu1 %vm864_vm6, %v1658_v25  ;;  %v1361_v32 = vpop.permute.xlu1 %1360  ;;  %v1359_v33 = vpop.permute.xlu0 %1358 }
 0x2b3   :  { %1124 = vmatpush1.msra.mxu1 %v1117_v26  ;;  %1187 = vmatprep.mubr.f32.mxu1 %v1721_v3  ;;  %v1364_v35 = vsel %vm1362_vm10, %v1361_v32, %v1359_v33  ;;  %v1363_v39 = vsel %vm1362_vm10, %v1359_v33, %v1361_v32 }
 0x2b4   :  { %1201 = vmatprep.subr.mxu1 %v853_v6 }
 0x2b6   :  { %v1446_v37 = vpop.permute.xlu1 %1445  ;;  %v1444_v38 = vpop.permute.xlu0 %1443 }
 0x2b7   :  { %v1448_v40 = vsel %vm549_vm3, %v1446_v37, %v1444_v38  ;;  %v1447_v44 = vsel %vm549_vm3, %v1444_v38, %v1446_v37 }
 0x2ba   :  { %1661 = vmatmul.mubr.msk.f32.vlgmr.msra.gmra.mrb[0].mxu1 %vm864_vm6, %v1660_v27  ;;  %v1530_v42 = vpop.permute.xlu1 %1529  ;;  %v1528_v43 = vpop.permute.xlu0 %1527 }
 0x2bb   :  { %1202 = vmatpush1.msra.mxu1 %v1874_v5  ;;  %1265 = vmatprep.mubr.f32.mxu1 %v1721_v3  ;;  %v1532_v45 = vsel %vm731_vm4, %v1530_v42, %v1528_v43  ;;  %v1531_v47 = vsel %vm731_vm4, %v1528_v43, %v1530_v42 }
 0x2bc   :  { %1285 = vmatprep.subr.mxu1 %v1279_v30 }
 0x2c2   :  { %1663 = vmatmul.mubr.msk.f32.vlgmr.msra.gmra.mrb[0].mxu1 %vm864_vm6, %v1662_v31 }
 0x2c3   :  { %1286 = vmatpush1.msra.mxu1 %v1278_v34  ;;  %1349 = vmatprep.mubr.f32.mxu1 %v1721_v3 }
 0x2c4   :  { %1370 = vmatprep.subr.mxu1 %v1364_v35 }
 0x2ca   :  { %1665 = vmatmul.mubr.msk.f32.vlgmr.msra.gmra.mrb[0].mxu1 %vm864_vm6, %v1664_v36 }
 0x2cb   :  { %1371 = vmatpush1.msra.mxu1 %v1363_v39  ;;  %1434 = vmatprep.mubr.f32.mxu1 %v1721_v3 }
 0x2cc   :  { %1454 = vmatprep.subr.mxu1 %v1448_v40 }
 0x2d2   :  { %1667 = vmatmul.mubr.msk.f32.vlgmr.msra.gmra.mrb[0].mxu1 %vm864_vm6, %v1666_v41 }
 0x2d3   :  { %1455 = vmatpush1.msra.mxu1 %v1447_v44  ;;  %1518 = vmatprep.mubr.f32.mxu1 %v1721_v3 }
 0x2d4   :  { %1538 = vmatprep.subr.mxu1 %v1532_v45 }
 0x2da   :  { %1669 = vmatmul.mubr.msk.f32.vlgmr.msra.gmra.mrb[0].mxu1 %vm864_vm6, %v1668_v46 }
 0x2db   :  { %1539 = vmatpush1.msra.mxu1 %v1531_v47  ;;  %1602 = vmatprep.mubr.f32.mxu1 %v1721_v3 }
 0x2e2   :  { %1671 = vmatmul.mubr.msk.f32.vlgmr.msra.gmra.mrb[0].mxu1 %vm864_vm6, %v1670_v48 }
 0x3b5   :  { %v1604_v50 = vpop.f32.mrb[0].mxu1 }
 0x3b6   :  { %v1672_v51 = vadd.f32 %v1604_v50, %v854_v49  ;;  %v1606_v52 = vpop.f32.mrb[1].mxu1 }
 0x3b7   :  { %v1673_v53 = vadd.f32 %v1606_v52, %v855_v10 }
 0x3b8   :  { %1611 = vst [vmem:[%s1969_s5] sm:$0xff] %v1672_v51 }
 0x3b9   :  { %1612 = vst [vmem:[%s1969_s5 + $0x8] sm:$0xff] %v1673_v53 }

</bundles_post_ra>
